<compile_context>
chip_gen: v6e
topology: v6e:2x2x1
jax: 0.10.0
libtpu: 0.0.40
codegen_flags: <defaults>
</compile_context>

<pallas_src>
import functools

import jax
import jax.numpy as jnp
from jax.experimental import pallas as pl
from jax.experimental.pallas import tpu as pltpu


def _text_embedding_kernel(ids_ref, table_ref, out_ref, *,
                           V, training, p_tkn, p_emb, seed):
    TM = out_ref.shape[0]                      # rows (flattened B*L tokens) this tile
    ids = ids_ref[0, :]                        # (TM,) int32 token ids for this tile

    # One-hot gather via MXU: (TM, V) @ (V, D) -> (TM, D).  Keep everything f32 so
    # the gathered values are bit-exact copies of the table rows.
    iota_v = jax.lax.broadcasted_iota(jnp.int32, (TM, V), dimension=1)
    onehot = (ids[:, None] == iota_v).astype(table_ref.dtype)
    emb = jnp.dot(onehot, table_ref[...], preferred_element_type=jnp.float32)  # (TM, D)

    if training and (p_tkn > 0.0 or p_emb > 0.0):
        # TODO(synk): PyTorch's dropout RNG stream cannot be reproduced bit-exactly;
        # only the semantics (Bernoulli keep mask + 1/(1-p) rescale) are reproduced.
        D = emb.shape[1]
        pltpu.prng_seed(seed + pl.program_id(0))
        # Combined rescale constant (fold both dropout scales into one multiply).
        scale = 1.0 / ((1.0 - p_tkn) * (1.0 - p_emb))
        thr_tok = jnp.uint32(min(int(round(p_tkn * (2 ** 32))), 2 ** 32 - 1))
        thr_elm = jnp.uint32(min(int(round(p_emb * (2 ** 32))), 2 ** 32 - 1))
        # Dropout2d on [B, L, D] drops whole token-embedding vectors: one keep bit
        # per token (minimum-size (TM, 128) draw, column 0), broadcast over D.
        bits_tok = pltpu.bitcast(pltpu.prng_random_bits((TM, 128)), jnp.uint32)[:, 0:1]
        bits_elm = pltpu.bitcast(pltpu.prng_random_bits((TM, D)), jnp.uint32)
        keep = jnp.logical_and(bits_tok >= thr_tok, bits_elm >= thr_elm)
        emb = jnp.where(keep, emb * scale, 0.0)

    out_ref[...] = emb.astype(out_ref.dtype)


def text_embedding_forward(ids, table, *, training=False,
                           tkn_dropout=0.3, emb_dropout=0.3, seed=0):
    """Pallas equivalent of TextEmbedding.forward.

    ids:   [B, L] int32 token indices
    table: [V, D] float32 embedding matrix
    returns [B, L, D] float32
    """
    B, L = ids.shape
    V, D = table.shape
    BL = B * L

    # Row-tile over the flattened token axis. 256 rows matches the v6e/v7x MXU
    # height; anything <= 256 is handled as a single full-extent tile.
    TM = BL if BL <= 256 else 256
    pad = (-BL) % TM
    ids_flat = ids.reshape(BL).astype(jnp.int32)
    if pad:
        ids_flat = jnp.concatenate([ids_flat, jnp.zeros((pad,), jnp.int32)])
    BLp = BL + pad
    num_tiles = BLp // TM
    ids2d = ids_flat.reshape(1, BLp)           # lane-major id layout, one row

    kernel = functools.partial(
        _text_embedding_kernel, V=V, training=training,
        p_tkn=float(tkn_dropout), p_emb=float(emb_dropout), seed=seed)

    # Explicit VMEM budget: table (double-buffered by the auto-pipeline even though
    # its block never changes), output tile, ids tile, one-hot intermediate + slack.
    # TODO(synk): for realistic vocab sizes, tile V across a reduction grid axis (or
    # switch to a scalar-prefetch row gather) instead of keeping the table resident.
    needed = (2 * V * D * 4 + 2 * TM * D * 4 + TM * V * 4 + 2 * BLp * 4) + (8 << 20)
    vmem_limit = max(needed, 32 << 20)

    out_flat = pl.pallas_call(
        kernel,
        out_shape=jax.ShapeDtypeStruct((BLp, D), jnp.float32),
        grid_spec=pltpu.PrefetchScalarGridSpec(
            num_scalar_prefetch=0,
            grid=(num_tiles,),                                   # row-tiles of B*L tokens
            in_specs=[
                pl.BlockSpec((1, TM), lambda i: (0, i)),         # ids for this row-tile
                pl.BlockSpec((V, D), lambda i: (0, 0)),          # full table resident in VMEM
            ],
            out_specs=pl.BlockSpec((TM, D), lambda i: (i, 0)),   # lane-dense 2-D slab
        ),
        compiler_params=pltpu.CompilerParams(
            dimension_semantics=("parallel",),                   # independent tiles -> 2 TCs on v7x
            vmem_limit_bytes=int(vmem_limit)),
        cost_estimate=pl.CostEstimate(
            flops=2 * BLp * V * D,
            transcendentals=0,
            bytes_accessed=BLp * 4 + V * D * 4 + BLp * D * 4),
    )(ids2d, table)

    return out_flat[:BL].reshape(B, L, D)


if __name__ == "__main__":
    # Small, deterministic synthetic setup consistent with the module's __init__:
    # a pretrained embedding matrix of shape [vocab, emb_dim].
    V, D = 64, 128          # vocab size, embedding dim (lane-aligned)
    B, L = 2, 8             # batch, sequence length

    key = jax.random.PRNGKey(0)
    k_tab, k_ids = jax.random.split(key)
    embedding = jax.random.normal(k_tab, (V, D), dtype=jnp.float32)
    x = jax.random.randint(k_ids, (B, L), minval=0, maxval=V, dtype=jnp.int32)

    # Eval-mode forward (dropout layers are identity), matching PyTorch eval().
    out = text_embedding_forward(x, embedding, training=False)
    out = jax.block_until_ready(out)

    ref = embedding[x]  # pure-JAX reference for the embedding lookup
    assert out.shape == (B, L, D)
    assert jnp.allclose(out, ref, atol=1e-6), "mismatch vs reference embedding lookup"
    print("KERNEL_OK")
</pallas_src>

<mosaic_0001>
module attributes {stable_mosaic.version = 11 : i64} {
  func.func @_text_embedding_kernel(%arg0: i32, %arg1: memref<1x16xi32, #tpu.memory_space<vmem>>, %arg2: memref<64x128xf32, #tpu.memory_space<vmem>>, %arg3: memref<16x128xf32, #tpu.memory_space<vmem>>) attributes {dimension_semantics = [#tpu.dimension_semantics<parallel>], iteration_bounds = array<i64: 1>, scalar_prefetch = 0 : i64, scratch_operands = 0 : i64, tpu.core_type = #tpu.core_type<tc>, window_params = [{transform_indices = @transform_0, window_bounds = array<i64: 1, 16>}, {pipeline_mode = #tpu.pipeline_mode<synchronous>, transform_indices = @transform_1, window_bounds = array<i64: 64, 128>}, {transform_indices = @transform_2, window_bounds = array<i64: 16, 128>}]} {
    %c0 = arith.constant 0 : index
    %c0_0 = arith.constant 0 : index
    %0 = vector.load %arg1[%c0, %c0_0] : memref<1x16xi32, #tpu.memory_space<vmem>>, vector<1x16xi32>
    %1 = vector.shape_cast %0 : vector<1x16xi32> to vector<16xi32>
    %2 = tpu.iota {dimensions = array<i32: 1>} : vector<16x64xi32>
    %3 = vector.shape_cast %1 : vector<16xi32> to vector<16x1xi32>
    %4 = vector.broadcast %3 : vector<16x1xi32> to vector<16x64xi32>
    %5 = arith.cmpi eq, %4, %2 : vector<16x64xi32>
    %6 = arith.extui %5 : vector<16x64xi1> to vector<16x64xi32>
    %7 = arith.sitofp %6 : vector<16x64xi32> to vector<16x64xf32>
    %c0_1 = arith.constant 0 : index
    %c0_2 = arith.constant 0 : index
    %8 = vector.load %arg2[%c0_1, %c0_2] : memref<64x128xf32, #tpu.memory_space<vmem>>, vector<64x128xf32>
    %cst = arith.constant dense<0.000000e+00> : vector<16x128xf32>
    %9 = tpu.matmul %7, %8, %cst {dimension_numbers = #tpu.dot_dimension_numbers<[1], [0], [0], [1], [0, 0, 1, 1], [], []>} : vector<16x64xf32>, vector<64x128xf32>, vector<16x128xf32> -> vector<16x128xf32>
    %c0_3 = arith.constant 0 : index
    %c0_4 = arith.constant 0 : index
    %10 = vector.load %arg3[%c0_3, %c0_4] : memref<16x128xf32, #tpu.memory_space<vmem>>, vector<16x128xf32>
    tpu.vector_store %arg3[%c0_3, %c0_4], %9 {strides = array<i32>} : memref<16x128xf32, #tpu.memory_space<vmem>>, vector<16x128xf32>,
    return
  }
  func.func @transform_0(%arg0: i32) -> (i32, i32) {
    %c0_i32 = arith.constant 0 : i32
    %c0_i32_0 = arith.constant 0 : i32
    return %c0_i32, %arg0 : i32, i32
  }
  func.func @transform_1(%arg0: i32) -> (i32, i32) {
    %c0_i32 = arith.constant 0 : i32
    %c0_i32_0 = arith.constant 0 : i32
    %c0_i32_1 = arith.constant 0 : i32
    return %c0_i32, %c0_i32_0 : i32, i32
  }
  func.func @transform_2(%arg0: i32) -> (i32, i32) {
    %c0_i32 = arith.constant 0 : i32
    %c0_i32_0 = arith.constant 0 : i32
    return %arg0, %c0_i32 : i32, i32
  }
}

</mosaic_0001>

<bundles_post_ra>
// kernel: tpu_custom_call.1
= control target key start
LH: loop header
LB: loop body
LE: loop exit
PB: predicated region body
PF: predicated region fallthrough
CT: control target
= control target key end

     0   :  { %7 = vsyncpa [#allocation3], 0  ;;  %s310_s0 = inlined_call_operand.hbm [shape: s32[1,16], index: 0, kind: input, shape index: {}]   ;;  %s311_s1 = inlined_call_operand.hbm [shape: f32[64,128], index: 1, kind: input, shape index: {}]   ;;  %s312_s2 = inlined_call_operand.hbm [shape: f32[16,128], index: 2, kind: output, shape index: {}]  }
   0x1   :  { %8 = vsyncpa [#allocation6], 0 }
   0x2   :  { %9 = vsyncpa [#allocation4], 0  ;;  %s274_s9 = smov [#allocation2]   ;;  %s275_s11 = smov [#allocation5]  }
   0x3   :  { %s16_s10 = sshll.u32 %s274_s9, 4  ;;  %s25_s12 = sshll.u32 %s275_s11, 4  ;;  %s17_s10 = int_to_ptr.vmem [resolvable:$true] %s16_s10  ;;  %s26_s12 = int_to_ptr.vmem [resolvable:$true] %s25_s12 }
   0x4   :  { %s216_s13 = scalar_lea.vmem %s17_s10, 16  ;;  %s220_s14 = scalar_lea.vmem %s17_s10, 32 }
   0x5   :  { %p217_p0 = scmp.ne.s32.totalorder %s17_s10, %s216_s13  ;;  %p221_p1 = scmp.lt.s32.totalorder %s17_s10, %s17_s10 }
   0x6   :  { %p222_p2 = scmp.lt.s32.totalorder %s220_s14, %s216_s13 }
   0x8   :  { %p223_p3 = por %p222_p2, %p221_p1 }
   0xa   :  { %p224_p4 = pnand %p223_p3, %p217_p0 }
   0xc   :  { %227 = shalt.err (!%p224_p4)
}
   0xd   :  { %19 = dma.hbm_to_vmem [thread:$0]  %s310_s0, 16, %s17_s10, [#allocation3]  }
   0xe   :  { %s236_s17 = scalar_lea.vmem %s26_s12, 1024  ;;  %p241_p6 = scmp.lt.s32.totalorder %s26_s12, %s26_s12 }
   0xf   :  { %p237_p5 = scmp.ne.s32.totalorder %s26_s12, %s236_s17  ;;  %p242_p7 = scmp.lt.s32.totalorder %s236_s17, %s236_s17 }
  0x11   :  { %p243_p8 = por %p242_p7, %p241_p6 }
  0x13   :  { %p244_p9 = pnand %p243_p8, %p237_p5 }
  0x15   :  { %247 = shalt.err (!%p244_p9)
}
  0x16   :  { %s276_s18 = smov 128   ;;  %s277_s19 = smov 8  }
  0x17   :  { %31 = dma.hbm_to_vmem [thread:$0]  %s311_s1, 1024, %s26_s12, [#allocation6], %s276_s18, %s276_s18, %s277_s19  }
  0x18   :  { %268 = dma.done.wait [#allocation3], 16  }
  0x19   :  { %269 = vsyncadd [#allocation3], 4294967280 }
  0x1a   :  { %270 = dma.done.wait [#allocation6], 1024  }
  0x1b   :  { %271 = vsyncadd [#allocation6], 4294966272  ;;  %v168_v0 = vld [vmem:[#allocation2] ss:$0 sm:$0xff]  ;;  %v64_v2 = vld [vmem:[#allocation5 + $0x30] sm:$0xff]  ;;  %v39_v9 = vlaneseq  ;;  %vm66_vm0 = vcmask 523264  }
  0x1c   :  { %v65_v1 = vld [vmem:[#allocation5 + $0x38] sm:$0xff]  ;;  %46 = vbcast.lane.b32.xlu0 %v168_v0, 256  ;;  %v63_v3 = vld [vmem:[#allocation5 + $0x28] sm:$0xff]  ;;  %v62_v4 = vld [vmem:[#allocation5 + $0x20] sm:$0xff]  ;;  %v278_v12 = vmov 0.0   ;;  %s279_s0 = smov [#allocation7]  }
  0x1d   :  { %183 = vmatprep.subr.mxu0 %v65_v1  ;;  %v61_v5 = vld [vmem:[#allocation5 + $0x18] sm:$0xff]  ;;  %v60_v6 = vld [vmem:[#allocation5 + $0x10] sm:$0xff]  ;;  %v59_v7 = vld [vmem:[#allocation5 + $0x8] sm:$0xff]  ;;  %v40_v10 = vand.u32 127, %v39_v9  ;;  %s155_s1 = sshll.u32 %s279_s0, 4  ;;  %s156_s1 = int_to_ptr.vmem [resolvable:$true] %s155_s1 }
  0x1e   :  { %184 = vmatpush3.msra.mxu0 %v65_v1  ;;  %v58_v8 = vld [vmem:[#allocation5] sm:$0xff]  ;;  %s248_s22 = scalar_lea.vmem %s156_s1, 256  ;;  %p253_p11 = scmp.lt.s32.totalorder %s156_s1, %s156_s1 }
  0x1f   :  { %185 = vmatprep.subr.mxu0 %v64_v2  ;;  %p249_p10 = scmp.ne.s32.totalorder %s156_s1, %s248_s22  ;;  %p254_p12 = scmp.lt.s32.totalorder %s248_s22, %s248_s22 }
  0x20   :  { %186 = vmatpush3.msra.mxu0 %v64_v2  ;;  %50 = vbcast.lane.b32.xlu0 %v168_v0, 264 }
  0x21   :  { %187 = vmatprep.subr.mxu0 %v63_v3  ;;  %p255_p13 = por %p254_p12, %p253_p11 }
  0x22   :  { %188 = vmatpush3.msra.mxu0 %v63_v3 }
  0x23   :  { %189 = vmatprep.subr.mxu0 %v62_v4  ;;  %p256_p0 = pnand %p255_p13, %p249_p10 }
  0x24   :  { %190 = vmatpush3.msra.mxu0 %v62_v4 }
  0x25   :  { %191 = vmatprep.subr.mxu0 %v61_v5 }
  0x26   :  { %192 = vmatpush3.msra.mxu0 %v61_v5 }
  0x27   :  { %193 = vmatprep.subr.mxu0 %v60_v6 }
  0x28   :  { %194 = vmatpush3.msra.mxu0 %v60_v6 }
  0x29   :  { %195 = vmatprep.subr.mxu0 %v59_v7 }
  0x2a   :  { %196 = vmatpush3.msra.mxu0 %v59_v7 }
  0x2b   :  { %197 = vmatprep.subr.mxu0 %v58_v8 }
  0x2c   :  { %198 = vmatpush3.msra.mxu0 %v58_v8 }
  0x8e   :  { %v47_v11 = vpop.permute.xlu0 %46 }
  0x8f   :  { %vm52_vm1 = vcmp.eq.s32.totalorder %v47_v11, %v40_v10 }
  0x90   :  { %v169_v13 = vsel %vm52_vm1, 1.0, %v278_v12 }
  0x91   :  { %199 = vmatprep.mubr.msk.f32.mxu0 %vm66_vm0, %v169_v13 }
  0x92   :  { %v51_v14 = vpop.permute.xlu0 %50 }
  0x93   :  { %vm53_vm2 = vcmp.eq.s32.totalorder %v51_v14, %v40_v10 }
  0x94   :  { %v170_v15 = vsel %vm53_vm2, 1.0, %v278_v12 }
  0x95   :  { %200 = vmatmul.mubr.msk.f32.vlgmr.msra.gmra.mxu0 %vm66_vm0, %v170_v15 }
 0x155   :  { %v201_v16 = vpop.f32.mrf.mxu0 }
 0x156   :  { %149 = vst [vmem:[#allocation7 + $0x8] sm:$0xff] %v201_v16 }
 0x157   :  { %v139_v17 = vpop.f32.mrf.mxu0 }
 0x158   :  { %148 = vst [vmem:[#allocation7] sm:$0xff] %v139_v17 }
 0x159   :  { %259 = shalt.err (!%p256_p0)
}
 0x15a   :  { %161 = dma.vmem_to_hbm [thread:$0]  %s156_s1, 256, %s312_s2, [#allocation4], %s276_s18, %s276_s18, %s277_s19  }
 0x15b   :  { %272 = dma.done.wait [#allocation4], 256  }
 0x15c   :  { %273 = vsyncadd [#allocation4], 4294967040 }
 0x15d   :  { %165 = vsyncpa [#allocation3], 1 }
 0x15e   :  { %166 = vsyncpa [#allocation6], 1 }
 0x15f   :  { %167 = vsyncpa [#allocation4], 1 }

</bundles_post_ra>
